<compile_context>
chip_gen: v7x
topology: tpu7x:2x2x1
jax: 0.10.0
libtpu: 0.0.40
codegen_flags: <defaults>
</compile_context>

<pallas_src>
import jax
import jax.numpy as jnp
from jax.experimental import pallas as pl
from jax.experimental.pallas import tpu as pltpu

LN_EPS = 1e-5  # PyTorch nn.LayerNorm default


# --------------------------- tiling helpers ---------------------------

def _pick_row_tile(n, max_tile=512):
    """Largest row tile that divides n, is a multiple of 8, and is <= max_tile."""
    if n % 8 != 0:
        return n  # fall back to full-extent block (allowed by the (8,128) rule)
    tm = min(n, max_tile)
    while n % tm != 0:
        tm -= 8
    return max(tm, 8)


def _pick_out_tile(dout, max_tile=512):
    """Largest Dout tile that divides dout, is a multiple of 128, <= max_tile."""
    if dout % 128 != 0:
        return dout  # toy sizes: keep the full (non-lane-dense) extent
    tn = min(dout, max_tile)
    while dout % tn != 0:
        tn -= 128
    return max(tn, 128)


def _invariant_spec(block_shape, index_map):
    """BlockSpec for grid-invariant / rarely-changing operands.

    Single-buffered when the installed JAX exposes pipeline_mode; halving the
    weight tile's VMEM footprint is the biggest VMEM saving on v7x's 64 MiB.
    Falls back to a default (double-buffered) spec otherwise.
    """
    if hasattr(pl, "Buffered"):
        try:
            return pl.BlockSpec(block_shape, index_map,
                                pipeline_mode=pl.Buffered(1))
        except TypeError:
            pass
    return pl.BlockSpec(block_shape, index_map)


# --------------------------- fused Pallas kernel ---------------------------

def _prenorm_fused_kernel(x_ref, ctx_ref, gx_ref, bx_ref, gc_ref, bc_ref,
                          wx_ref, wc_ref, bias_ref, o_ref, c_acc):
    """Grid (B, Dout_tiles, row_tiles); row-tile axis last and "arbitrary".

    Per-step blocks:
      x_ref    (1, TM, D)     ctx_ref  (1, M, C)
      gx/bx    (1, D)         gc/bc    (1, C)
      wx_ref   (D, TN)        wc_ref   (C, TN)     bias_ref (1, TN)
      o_ref    (1, TM, TN)    c_acc    VMEM (1, TN) f32 scratch
    """
    i = pl.program_id(2)  # row-tile index (fastest axis)

    # Context path: LN over C, mean-pool over M, GEMV through Wc, plus the
    # folded (bx + bc) bias. Computed once per (batch, Dout-tile) and carried
    # across the row-tile axis in f32 (no dtype round-trip through HBM).
    @pl.when(i == 0)
    def _():
        ctx = ctx_ref[0].astype(jnp.float32)                          # (M, C)
        mu = jnp.mean(ctx, axis=-1, keepdims=True)
        ex2 = jnp.mean(ctx * ctx, axis=-1, keepdims=True)
        var = jnp.maximum(ex2 - mu * mu, 0.0)                         # biased, like torch
        cn = (ctx - mu) * jax.lax.rsqrt(var + LN_EPS)
        cn = cn * gc_ref[...].astype(jnp.float32) + bc_ref[...].astype(jnp.float32)
        pooled = jnp.mean(cn, axis=0, keepdims=True)                  # (1, C)
        # MXU runs in the weight's native dtype; f32 accumulate only.
        c = jnp.dot(pooled.astype(wc_ref.dtype), wc_ref[...],
                    preferred_element_type=jnp.float32)               # (1, TN)
        c_acc[...] = c + bias_ref[...].astype(jnp.float32)

    # x path: LN over D (one-pass stats), affine, matmul, add context term.
    x = x_ref[0].astype(jnp.float32)                                  # (TM, D)
    mu = jnp.mean(x, axis=-1, keepdims=True)
    ex2 = jnp.mean(x * x, axis=-1, keepdims=True)
    var = jnp.maximum(ex2 - mu * mu, 0.0)
    xn = (x - mu) * jax.lax.rsqrt(var + LN_EPS)
    xn = xn * gx_ref[...].astype(jnp.float32) + bx_ref[...].astype(jnp.float32)
    y = jnp.dot(xn.astype(wx_ref.dtype), wx_ref[...],
                preferred_element_type=jnp.float32)                   # (TM, TN)
    o_ref[0] = (y + c_acc[...]).astype(o_ref.dtype)


# --------------------------- wrapper (pallas_call) ---------------------------

def prenorm_forward(x, params, fn_params, *, context):
    """PreNorm.forward with the deterministic cross-linear `fn`, fully fused."""
    B, N, D = x.shape
    _, M, C = context.shape
    Dout = fn_params["Wx"].shape[1]

    TM = _pick_row_tile(N)
    TN = _pick_out_tile(Dout)
    grid = (B, Dout // TN, N // TM)

    # Fold fn's two biases once on the parameter side; added in-kernel as part
    # of the per-(batch, Dout-tile) context accumulator.
    bias_total = (fn_params["bx"].astype(jnp.float32)
                  + fn_params["bc"].astype(jnp.float32)).reshape(1, Dout)

    # Explicit scoped-VMEM budget derived from the chosen tiles (x2 margin;
    # streams counted double-buffered even where Buffered(1) applies).
    act_it = x.dtype.itemsize
    w_it = fn_params["Wx"].dtype.itemsize
    est = (2 * TM * D * act_it                       # x blocks
           + 2 * M * C * context.dtype.itemsize      # context blocks
           + 2 * (D + C + Dout) * 4                  # gamma/beta/bias
           + 2 * (D * TN + C * TN) * w_it            # weight tiles
           + 2 * TM * TN * act_it                    # output blocks
           + TN * 4)                                 # scratch
    vmem_limit = min(64 << 20, max(8 << 20, 2 * est))

    in_specs = [
        pl.BlockSpec((1, TM, D), lambda b, j, i: (b, i, 0)),    # x
        pl.BlockSpec((1, M, C), lambda b, j, i: (b, 0, 0)),     # context
        _invariant_spec((1, D), lambda b, j, i: (0, 0)),        # LN(dim) gamma
        _invariant_spec((1, D), lambda b, j, i: (0, 0)),        # LN(dim) beta
        _invariant_spec((1, C), lambda b, j, i: (0, 0)),        # LN(ctx) gamma
        _invariant_spec((1, C), lambda b, j, i: (0, 0)),        # LN(ctx) beta
        _invariant_spec((D, TN), lambda b, j, i: (0, j)),       # Wx tile
        _invariant_spec((C, TN), lambda b, j, i: (0, j)),       # Wc tile
        _invariant_spec((1, TN), lambda b, j, i: (0, j)),       # folded bias
    ]

    return pl.pallas_call(
        _prenorm_fused_kernel,
        out_shape=jax.ShapeDtypeStruct((B, N, Dout), x.dtype),
        grid=grid,
        in_specs=in_specs,
        out_specs=pl.BlockSpec((1, TM, TN), lambda b, j, i: (b, i, j)),
        scratch_shapes=[pltpu.VMEM((1, TN), jnp.float32)],
        compiler_params=pltpu.CompilerParams(
            # Row-tile axis MUST be "arbitrary": the context accumulator in
            # scratch is initialized at row tile 0 and reused along that axis.
            dimension_semantics=("parallel", "parallel", "arbitrary"),
            vmem_limit_bytes=int(vmem_limit)),
    )(x, context,
      params["ln_g"].reshape(1, D), params["ln_b"].reshape(1, D),
      params["lnc_g"].reshape(1, C), params["lnc_b"].reshape(1, C),
      fn_params["Wx"], fn_params["Wc"], bias_total)


# --------------------------- reference (plain JAX) ---------------------------

def _ln_ref(x, g, b):
    mean = jnp.mean(x, axis=-1, keepdims=True)
    var = jnp.mean((x - mean) ** 2, axis=-1, keepdims=True)
    return (x - mean) * jax.lax.rsqrt(var + LN_EPS) * g + b


def _forward_ref(x, context, params, fn_params):
    xn = _ln_ref(x, params["ln_g"], params["ln_b"])
    cn = _ln_ref(context, params["lnc_g"], params["lnc_b"])
    y = jnp.einsum("bnd,de->bne", xn, fn_params["Wx"]) + fn_params["bx"]
    c = cn.mean(axis=1) @ fn_params["Wc"] + fn_params["bc"]
    return y + c[:, None, :]


# --------------------------- main ---------------------------

if __name__ == "__main__":
    B, N, D = 2, 8, 32       # x: batch, tokens, dim
    M, C = 8, 16             # context: context tokens, context_dim
    dtype = jnp.float32

    key = jax.random.PRNGKey(0)
    (k_x, k_ctx, k_wx, k_wc, k_g, k_b, k_gc, k_bc,
     k_bx, k_bcl) = jax.random.split(key, 10)

    x = jax.random.normal(k_x, (B, N, D), dtype=dtype)
    context = jax.random.normal(k_ctx, (B, M, C), dtype=dtype)

    # Non-trivial LayerNorm affine params so the affine path is actually tested.
    params = {
        "ln_g": 1.0 + 0.1 * jax.random.normal(k_g, (D,), dtype),
        "ln_b": 0.1 * jax.random.normal(k_b, (D,), dtype),
        "lnc_g": 1.0 + 0.1 * jax.random.normal(k_gc, (C,), dtype),
        "lnc_b": 0.1 * jax.random.normal(k_bc, (C,), dtype),
    }
    # Deterministic params for the wrapped fn (cross-linear stand-in),
    # with non-zero biases so the bias fold is exercised.
    fn_params = {
        "Wx": (0.02 * jax.random.normal(k_wx, (D, D))).astype(dtype),
        "bx": 0.1 * jax.random.normal(k_bx, (D,), dtype),
        "Wc": (0.02 * jax.random.normal(k_wc, (C, D))).astype(dtype),
        "bc": 0.1 * jax.random.normal(k_bcl, (D,), dtype),
    }

    out = prenorm_forward(x, params, fn_params, context=context)
    out = jax.block_until_ready(out)

    ref = _forward_ref(x, context, params, fn_params)
    assert out.shape == (B, N, D)
    assert jnp.allclose(out, ref, atol=1e-4, rtol=1e-4)

    print("KERNEL_OK")
</pallas_src>

<mosaic_0001>
module attributes {stable_mosaic.version = 11 : i64} {
  func.func @_prenorm_fused_kernel(%arg0: i32, %arg1: i32, %arg2: i32, %arg3: memref<1x8x32xf32, #tpu.memory_space<vmem>>, %arg4: memref<1x8x16xf32, #tpu.memory_space<vmem>>, %arg5: memref<1x32xf32, #tpu.memory_space<vmem>>, %arg6: memref<1x32xf32, #tpu.memory_space<vmem>>, %arg7: memref<1x16xf32, #tpu.memory_space<vmem>>, %arg8: memref<1x16xf32, #tpu.memory_space<vmem>>, %arg9: memref<32x32xf32, #tpu.memory_space<vmem>>, %arg10: memref<16x32xf32, #tpu.memory_space<vmem>>, %arg11: memref<1x32xf32, #tpu.memory_space<vmem>>, %arg12: memref<1x8x32xf32, #tpu.memory_space<vmem>>, %arg13: memref<1x32xf32, #tpu.memory_space<vmem>>) attributes {dimension_semantics = [#tpu.dimension_semantics<parallel>, #tpu.dimension_semantics<parallel>, #tpu.dimension_semantics<arbitrary>], iteration_bounds = array<i64: 2, 1, 1>, scalar_prefetch = 0 : i64, scratch_operands = 1 : i64, tpu.core_type = #tpu.core_type<tc>, window_params = [{transform_indices = @transform_0, window_bounds = array<i64: 1, 8, 32>}, {transform_indices = @transform_1, window_bounds = array<i64: 1, 8, 16>}, {pipeline_mode = #tpu.pipeline_mode<synchronous>, transform_indices = @transform_2, window_bounds = array<i64: 1, 32>}, {pipeline_mode = #tpu.pipeline_mode<synchronous>, transform_indices = @transform_3, window_bounds = array<i64: 1, 32>}, {pipeline_mode = #tpu.pipeline_mode<synchronous>, transform_indices = @transform_4, window_bounds = array<i64: 1, 16>}, {pipeline_mode = #tpu.pipeline_mode<synchronous>, transform_indices = @transform_5, window_bounds = array<i64: 1, 16>}, {pipeline_mode = #tpu.pipeline_mode<synchronous>, transform_indices = @transform_6, window_bounds = array<i64: 32, 32>}, {pipeline_mode = #tpu.pipeline_mode<synchronous>, transform_indices = @transform_7, window_bounds = array<i64: 16, 32>}, {pipeline_mode = #tpu.pipeline_mode<synchronous>, transform_indices = @transform_8, window_bounds = array<i64: 1, 32>}, {transform_indices = @transform_9, window_bounds = array<i64: 1, 8, 32>}]} {
    %c0_i32 = arith.constant 0 : i32
    %0 = arith.cmpi eq, %arg2, %c0_i32 : i32
    %1 = arith.extui %0 : i1 to i32
    %c0_i32_0 = arith.constant 0 : i32
    %2 = arith.cmpi ne, %1, %c0_i32_0 : i32
    scf.if %2 {
      %c0_20 = arith.constant 0 : index
      %c0_21 = arith.constant 0 : index
      %c0_22 = arith.constant 0 : index
      %39 = vector.load %arg4[%c0_20, %c0_21, %c0_22] : memref<1x8x16xf32, #tpu.memory_space<vmem>>, vector<1x8x16xf32>
      %40 = vector.shape_cast %39 : vector<1x8x16xf32> to vector<8x16xf32>
      %cst_23 = arith.constant dense<0.000000e+00> : vector<8xf32>
      %41 = vector.multi_reduction <add>, %40, %cst_23 [1] : vector<8x16xf32> to vector<8xf32>
      %42 = vector.shape_cast %41 : vector<8xf32> to vector<8x1xf32>
      %cst_24 = arith.constant 1.600000e+01 : f32
      %43 = vector.broadcast %cst_24 : f32 to vector<8x1xf32>
      %44 = arith.divf %42, %43 : vector<8x1xf32>
      %45 = arith.mulf %40, %40 : vector<8x16xf32>
      %cst_25 = arith.constant dense<0.000000e+00> : vector<8xf32>
      %46 = vector.multi_reduction <add>, %45, %cst_25 [1] : vector<8x16xf32> to vector<8xf32>
      %47 = vector.shape_cast %46 : vector<8xf32> to vector<8x1xf32>
      %cst_26 = arith.constant 1.600000e+01 : f32
      %48 = vector.broadcast %cst_26 : f32 to vector<8x1xf32>
      %49 = arith.divf %47, %48 : vector<8x1xf32>
      %50 = arith.mulf %44, %44 : vector<8x1xf32>
      %51 = arith.subf %49, %50 : vector<8x1xf32>
      %cst_27 = arith.constant 0.000000e+00 : f32
      %52 = vector.broadcast %cst_27 : f32 to vector<8x1xf32>
      %53 = arith.maximumf %51, %52 : vector<8x1xf32>
      %54 = vector.broadcast %44 : vector<8x1xf32> to vector<8x16xf32>
      %55 = arith.subf %40, %54 : vector<8x16xf32>
      %cst_28 = arith.constant 9.99999974E-6 : f32
      %56 = vector.broadcast %cst_28 : f32 to vector<8x1xf32>
      %57 = arith.addf %53, %56 : vector<8x1xf32>
      %58 = math.rsqrt %57 : vector<8x1xf32>
      %59 = vector.broadcast %58 : vector<8x1xf32> to vector<8x16xf32>
      %60 = arith.mulf %55, %59 : vector<8x16xf32>
      %c0_29 = arith.constant 0 : index
      %c0_30 = arith.constant 0 : index
      %61 = vector.load %arg7[%c0_29, %c0_30] : memref<1x16xf32, #tpu.memory_space<vmem>>, vector<1x16xf32>
      %62 = vector.broadcast %61 : vector<1x16xf32> to vector<8x16xf32>
      %63 = arith.mulf %60, %62 : vector<8x16xf32>
      %c0_31 = arith.constant 0 : index
      %c0_32 = arith.constant 0 : index
      %64 = vector.load %arg8[%c0_31, %c0_32] : memref<1x16xf32, #tpu.memory_space<vmem>>, vector<1x16xf32>
      %65 = vector.broadcast %64 : vector<1x16xf32> to vector<8x16xf32>
      %66 = arith.addf %63, %65 : vector<8x16xf32>
      %cst_33 = arith.constant dense<0.000000e+00> : vector<16xf32>
      %67 = vector.multi_reduction <add>, %66, %cst_33 [0] : vector<8x16xf32> to vector<16xf32>
      %68 = vector.shape_cast %67 : vector<16xf32> to vector<1x16xf32>
      %cst_34 = arith.constant 8.000000e+00 : f32
      %69 = vector.broadcast %cst_34 : f32 to vector<1x16xf32>
      %70 = arith.divf %68, %69 : vector<1x16xf32>
      %c0_35 = arith.constant 0 : index
      %c0_36 = arith.constant 0 : index
      %71 = vector.load %arg10[%c0_35, %c0_36] : memref<16x32xf32, #tpu.memory_space<vmem>>, vector<16x32xf32>
      %cst_37 = arith.constant dense<0.000000e+00> : vector<1x32xf32>
      %72 = tpu.matmul %70, %71, %cst_37 {dimension_numbers = #tpu.dot_dimension_numbers<[1], [0], [0], [1], [0, 0, 1, 1], [], []>} : vector<1x16xf32>, vector<16x32xf32>, vector<1x32xf32> -> vector<1x32xf32>
      %c0_38 = arith.constant 0 : index
      %c0_39 = arith.constant 0 : index
      %73 = vector.load %arg11[%c0_38, %c0_39] : memref<1x32xf32, #tpu.memory_space<vmem>>, vector<1x32xf32>
      %74 = arith.addf %72, %73 : vector<1x32xf32>
      %c0_40 = arith.constant 0 : index
      %c0_41 = arith.constant 0 : index
      %75 = vector.load %arg13[%c0_40, %c0_41] : memref<1x32xf32, #tpu.memory_space<vmem>>, vector<1x32xf32>
      tpu.vector_store %arg13[%c0_40, %c0_41], %74 {strides = array<i32>} : memref<1x32xf32, #tpu.memory_space<vmem>>, vector<1x32xf32>,
    } else {
    }
    %c0 = arith.constant 0 : index
    %c0_1 = arith.constant 0 : index
    %c0_2 = arith.constant 0 : index
    %3 = vector.load %arg3[%c0, %c0_1, %c0_2] : memref<1x8x32xf32, #tpu.memory_space<vmem>>, vector<1x8x32xf32>
    %4 = vector.shape_cast %3 : vector<1x8x32xf32> to vector<8x32xf32>
    %cst = arith.constant dense<0.000000e+00> : vector<8xf32>
    %5 = vector.multi_reduction <add>, %4, %cst [1] : vector<8x32xf32> to vector<8xf32>
    %6 = vector.shape_cast %5 : vector<8xf32> to vector<8x1xf32>
    %cst_3 = arith.constant 3.200000e+01 : f32
    %7 = vector.broadcast %cst_3 : f32 to vector<8x1xf32>
    %8 = arith.divf %6, %7 : vector<8x1xf32>
    %9 = arith.mulf %4, %4 : vector<8x32xf32>
    %cst_4 = arith.constant dense<0.000000e+00> : vector<8xf32>
    %10 = vector.multi_reduction <add>, %9, %cst_4 [1] : vector<8x32xf32> to vector<8xf32>
    %11 = vector.shape_cast %10 : vector<8xf32> to vector<8x1xf32>
    %cst_5 = arith.constant 3.200000e+01 : f32
    %12 = vector.broadcast %cst_5 : f32 to vector<8x1xf32>
    %13 = arith.divf %11, %12 : vector<8x1xf32>
    %14 = arith.mulf %8, %8 : vector<8x1xf32>
    %15 = arith.subf %13, %14 : vector<8x1xf32>
    %cst_6 = arith.constant 0.000000e+00 : f32
    %16 = vector.broadcast %cst_6 : f32 to vector<8x1xf32>
    %17 = arith.maximumf %15, %16 : vector<8x1xf32>
    %18 = vector.broadcast %8 : vector<8x1xf32> to vector<8x32xf32>
    %19 = arith.subf %4, %18 : vector<8x32xf32>
    %cst_7 = arith.constant 9.99999974E-6 : f32
    %20 = vector.broadcast %cst_7 : f32 to vector<8x1xf32>
    %21 = arith.addf %17, %20 : vector<8x1xf32>
    %22 = math.rsqrt %21 : vector<8x1xf32>
    %23 = vector.broadcast %22 : vector<8x1xf32> to vector<8x32xf32>
    %24 = arith.mulf %19, %23 : vector<8x32xf32>
    %c0_8 = arith.constant 0 : index
    %c0_9 = arith.constant 0 : index
    %25 = vector.load %arg5[%c0_8, %c0_9] : memref<1x32xf32, #tpu.memory_space<vmem>>, vector<1x32xf32>
    %26 = vector.broadcast %25 : vector<1x32xf32> to vector<8x32xf32>
    %27 = arith.mulf %24, %26 : vector<8x32xf32>
    %c0_10 = arith.constant 0 : index
    %c0_11 = arith.constant 0 : index
    %28 = vector.load %arg6[%c0_10, %c0_11] : memref<1x32xf32, #tpu.memory_space<vmem>>, vector<1x32xf32>
    %29 = vector.broadcast %28 : vector<1x32xf32> to vector<8x32xf32>
    %30 = arith.addf %27, %29 : vector<8x32xf32>
    %c0_12 = arith.constant 0 : index
    %c0_13 = arith.constant 0 : index
    %31 = vector.load %arg9[%c0_12, %c0_13] : memref<32x32xf32, #tpu.memory_space<vmem>>, vector<32x32xf32>
    %cst_14 = arith.constant dense<0.000000e+00> : vector<8x32xf32>
    %32 = tpu.matmul %30, %31, %cst_14 {dimension_numbers = #tpu.dot_dimension_numbers<[1], [0], [0], [1], [0, 0, 1, 1], [], []>} : vector<8x32xf32>, vector<32x32xf32>, vector<8x32xf32> -> vector<8x32xf32>
    %c0_15 = arith.constant 0 : index
    %c0_16 = arith.constant 0 : index
    %33 = vector.load %arg13[%c0_15, %c0_16] : memref<1x32xf32, #tpu.memory_space<vmem>>, vector<1x32xf32>
    %34 = vector.broadcast %33 : vector<1x32xf32> to vector<8x32xf32>
    %35 = arith.addf %32, %34 : vector<8x32xf32>
    %c0_17 = arith.constant 0 : index
    %c0_18 = arith.constant 0 : index
    %c0_19 = arith.constant 0 : index
    %36 = vector.load %arg12[%c0_17, %c0_18, %c0_19] : memref<1x8x32xf32, #tpu.memory_space<vmem>>, vector<1x8x32xf32>
    %37 = vector.shape_cast %36 : vector<1x8x32xf32> to vector<8x32xf32>
    %38 = vector.shape_cast %35 : vector<8x32xf32> to vector<1x8x32xf32>
    tpu.vector_store %arg12[%c0_17, %c0_18, %c0_19], %38 {strides = array<i32>} : memref<1x8x32xf32, #tpu.memory_space<vmem>>, vector<1x8x32xf32>,
    return
  }
  func.func @transform_0(%arg0: i32, %arg1: i32, %arg2: i32) -> (i32, i32, i32) {
    %c0_i32 = arith.constant 0 : i32
    %c0_i32_0 = arith.constant 0 : i32
    return %arg0, %arg2, %c0_i32 : i32, i32, i32
  }
  func.func @transform_1(%arg0: i32, %arg1: i32, %arg2: i32) -> (i32, i32, i32) {
    %c0_i32 = arith.constant 0 : i32
    %c0_i32_0 = arith.constant 0 : i32
    %c0_i32_1 = arith.constant 0 : i32
    return %arg0, %c0_i32, %c0_i32_0 : i32, i32, i32
  }
  func.func @transform_2(%arg0: i32, %arg1: i32, %arg2: i32) -> (i32, i32) {
    %c0_i32 = arith.constant 0 : i32
    %c0_i32_0 = arith.constant 0 : i32
    %c0_i32_1 = arith.constant 0 : i32
    return %c0_i32, %c0_i32_0 : i32, i32
  }
  func.func @transform_3(%arg0: i32, %arg1: i32, %arg2: i32) -> (i32, i32) {
    %c0_i32 = arith.constant 0 : i32
    %c0_i32_0 = arith.constant 0 : i32
    %c0_i32_1 = arith.constant 0 : i32
    return %c0_i32, %c0_i32_0 : i32, i32
  }
  func.func @transform_4(%arg0: i32, %arg1: i32, %arg2: i32) -> (i32, i32) {
    %c0_i32 = arith.constant 0 : i32
    %c0_i32_0 = arith.constant 0 : i32
    %c0_i32_1 = arith.constant 0 : i32
    return %c0_i32, %c0_i32_0 : i32, i32
  }
  func.func @transform_5(%arg0: i32, %arg1: i32, %arg2: i32) -> (i32, i32) {
    %c0_i32 = arith.constant 0 : i32
    %c0_i32_0 = arith.constant 0 : i32
    %c0_i32_1 = arith.constant 0 : i32
    return %c0_i32, %c0_i32_0 : i32, i32
  }
  func.func @transform_6(%arg0: i32, %arg1: i32, %arg2: i32) -> (i32, i32) {
    %c0_i32 = arith.constant 0 : i32
    %c0_i32_0 = arith.constant 0 : i32
    return %c0_i32, %arg1 : i32, i32
  }
  func.func @transform_7(%arg0: i32, %arg1: i32, %arg2: i32) -> (i32, i32) {
    %c0_i32 = arith.constant 0 : i32
    %c0_i32_0 = arith.constant 0 : i32
    return %c0_i32, %arg1 : i32, i32
  }
  func.func @transform_8(%arg0: i32, %arg1: i32, %arg2: i32) -> (i32, i32) {
    %c0_i32 = arith.constant 0 : i32
    %c0_i32_0 = arith.constant 0 : i32
    return %c0_i32, %arg1 : i32, i32
  }
  func.func @transform_9(%arg0: i32, %arg1: i32, %arg2: i32) -> (i32, i32, i32) {
    %c0_i32 = arith.constant 0 : i32
    return %arg0, %arg2, %arg1 : i32, i32, i32
  }
}

</mosaic_0001>

<bundles_post_ra>
// kernel: tpu_custom_call.1
= control target key start
LH: loop header
LB: loop body
LE: loop exit
PB: predicated region body
PF: predicated region fallthrough
CT: control target
= control target key end

     0   :  { %s1538_s0 = inlined_call_operand.hbm [shape: f32[2,8,32], index: 0, kind: input, shape index: {}]   ;;  %s1539_s1 = inlined_call_operand.hbm [shape: f32[2,8,16], index: 1, kind: input, shape index: {}]   ;;  %s1540_s2 = inlined_call_operand.vmem [shape: f32[1,32], index: 2, kind: input, shape index: {}]   ;;  %s1541_s3 = inlined_call_operand.vmem [shape: f32[1,32], index: 3, kind: input, shape index: {}]   ;;  %s1542_s4 = inlined_call_operand.vmem [shape: f32[1,16], index: 4, kind: input, shape index: {}]   ;;  %s1543_s5 = inlined_call_operand.vmem [shape: f32[1,16], index: 5, kind: input, shape index: {}]   ;;  %s1544_s6 = inlined_call_operand.hbm [shape: f32[32,32], index: 6, kind: input, shape index: {}]   ;;  %s1545_s7 = inlined_call_operand.vmem [shape: f32[16,32], index: 7, kind: input, shape index: {}]   ;;  %s1546_s8 = inlined_call_operand.vmem [shape: f32[1,32], index: 8, kind: input, shape index: {}]   ;;  %s1547_s9 = inlined_call_operand.hbm [shape: f32[2,8,32], index: 9, kind: output, shape index: {}]  }
   0x1   :  { %1558 = sst [smem:[#allocation20_spill]] %s1544_s6 }
   0x2   :  { %1559 = sst [smem:[#allocation21_spill]] %s1547_s9 }
   0x3   :  { %14 = vsyncpa [#allocation4], 0 }
   0x4   :  { %16 = vsyncpa [#allocation4 + $0x1], 0 }
   0x5   :  { %17 = vsyncpa [#allocation7], 0 }
   0x6   :  { %19 = vsyncpa [#allocation7 + $0x1], 0 }
   0x7   :  { %20 = vsyncpa [#allocation5], 0 }
   0x8   :  { %22 = vsyncpa [#allocation5 + $0x1], 0  ;;  %s1258_s30 = smov 0   ;;  %s1260_s10 = smov 0  }
   0x9   :  { %s1262_s11 = smov 0   ;;  %s1264_s12 = smov 0  }
   0xa   :  { %s1266_s13 = smov 0   ;;  %s1268_s14 = smov 0  }
   0xb LB: > { %1560 = sst [smem:[#allocation14_spill]] %s1177_s30  ;;  %s1289_s15 = sadd.s32 4294967295, %s1197_s14   ;;  %s1197_s14 = sphi %s1268_s14, %s28_s14   ;;  %s1193_s13 = sphi %s1266_s13, %s1589_s13   ;;  %s1189_s12 = sphi %s1264_s12, %s1588_s12   ;;  %s1185_s11 = sphi %s1262_s11, %s1587_s11   ;;  %s1181_s10 = sphi %s1260_s10, %s1591_s10   ;;  %s1177_s30 = sphi %s1258_s30, %s1590_s30  }
   0xc   : > { %1561 = sst [smem:[#allocation15_spill]] %s1185_s11  ;;  %s871_s16 = sadd.s32 4294967294, %s1197_s14  }
   0xd   : > { %1562 = sst [smem:[#allocation16_spill]] %s1193_s13  ;;  %p69_p0 = scmp.ne.s32.totalorder %s1181_s10, %s1177_s30 }
   0xe   : > { %p1548_p1 = scmp.eq.s32.totalorder %s1289_s15, 0  ;;  %p291_p3 = scmp.eq.s32.totalorder %s871_s16, 1 }
   0xf   : > { %p872_p5 = scmp.ge.s32.totalorder %s1197_s14, 1  ;;  %p298_p7 = scmp.lt.s32.totalorder %s1197_s14, 3 }
  0x10   : > { %p1298_p4 = por %p1548_p1, %p69_p0  ;;  %p1303_p6 = por %p291_p3, %p69_p0 }
  0x11   : > { %p1308_p8 = pnand %p872_p5, %p298_p7  ;;  %s1199_s20 = smov [#allocation8]  }
  0x12   : > { %s1563_s17 = scalar_select %p1298_p4, 1, 0 }
  0x13   : > { %s1564_s18 = scalar_select %p1303_p6, 1, 0 }
  0x14   : > { %s1566_s19 = scalar_select %p1308_p8, 1, 0 }
  0x15   : > { %1565 = sst [smem:[#allocation17_spill]] %s1564_s18  ;;  %s324_s21 = sshll.u32 %s1199_s20, 4  ;;  %s325_s21 = int_to_ptr.vmem [resolvable:$true] %s324_s21 }
  0x16   : > { %p942_p9 = pneg %p1308_p8  ;;  %s47_s23 = sadd.s32 1, %s1193_s13 }
  0x17   : > { %s1568_s6 = sld [smem:[#allocation20_spill]] }
  0x18   : > { %p1317_p11 = pnand %p942_p9, %p1548_p1 }
  0x1a   : > { %p1021_p13 = pneg %p1317_p11 }
  0x1d   : > { %s1019_s26 = scalar_lea.hbm %s1568_s6, 512 }
  0x1e   : > { %p1020_p12 = scmp.ne.s32.totalorder %s1568_s6, %s1019_s26  ;;  %p1026_p5 = scmp.lt.u32.totalorder %s1019_s26, %s1568_s6 }
  0x20   : > { %p1022_p0 = pnand %p1021_p13, %p1020_p12 }
  0x22   : > { %p1023_p3 = pneg %p1022_p0 }
  0x24   : > { %p1028_p7 = pnand %p1026_p5, %p1023_p3 }
  0x26   : > { %1031 = shalt.err (!%p1028_p7)
}
  0x27   : > { %s1032_s20 = scalar_lea.vmem %s325_s21, 512  ;;  %p1040_p2 = scmp.lt.s32.totalorder %s325_s21, %s325_s21 }
  0x28   : > { %p1033_p9 = scmp.ne.s32.totalorder %s325_s21, %s1032_s20  ;;  %p1041_p6 = scmp.lt.s32.totalorder %s1032_s20, %s1032_s20 }
  0x2a   : > { %p1035_p10 = pnand %p1033_p9, %p1021_p13  ;;  %p1042_p4 = por %p1041_p6, %p1040_p2 }
  0x2c   : > { %p1036_p1 = pneg %p1035_p10 }
  0x2e   : > { %p1043_p8 = pnand %p1042_p4, %p1036_p1 }
  0x30   : > { %1046 = shalt.err (!%p1043_p8)
}
  0x31   : > { %s1200_s24 = smov 128   ;;  %s1201_s25 = smov 8  }
  0x32   : > { %945 = dma.hbm_to_vmem [thread:$0]  (!%p1317_p11), %s1568_s6, 512, %s325_s21, [#allocation7], %s1200_s24, %s1200_s24, %s1201_s25  }
  0x33   : > { %p49_p1 = scmp.ge.s32.totalorder %s47_s23, 2  ;;  %s56_s28 = sadd.s32 1, %s1185_s11 }
  0x34   : > { %p63_p2 = scmp.ne.s32.totalorder %s1185_s11, %s1181_s10  ;;  %p64_p4 = scmp.eq.s32.totalorder %s1197_s14, 0 }
  0x35   : > { %s1593_s23 = smov (%p49_p1, %s47_s23), 0  ;;  %p1571_p8 = scmp.eq.s32.totalorder %s1289_s15, 1 }
  0x36   : > { %1569 = sst [smem:[#allocation18_spill]] %s1593_s23  ;;  %p1344_p6 = por %p64_p4, %p63_p2 }
  0x37   : > { %p1350_p10 = por %p1571_p8, %p63_p2  ;;  %s51_s16 = ssub.s32 %s1193_s13, %s1593_s23 }
  0x38   : > { %p958_p11 = scmp.lt.s32.totalorder %s1197_s14, 2  ;;  %p54_p12 = scmp.eq.s32.totalorder %s51_s16, 0 }
  0x39   : > { %s1572_s22 = scalar_select %p1350_p10, 1, 0 }
  0x3a   : > { %s351_s21 = sand.u32 1, %s1185_s11   ;;  %s878_s25 = sshll.u32 %s1193_s13, 7 }
  0x3b   : > { %s1358_s20 = sshll.u32 %s351_s21, 3  ;;  %s1367_s6 = scalar_lea.hbm %s1538_s0, %s878_s25 }
  0x3c   : > { %s1361_s24 = scalar_select %p54_p12, %s1185_s11, %s56_s28  }
  0x3d   : > { %s355_s18 = scalar_lea.vmem [#allocation3], %s1358_s20  ;;  %p1374_p13 = pnand %p958_p11, %p1344_p6 }
  0x3e   : > { %1573 = sst [smem:[#allocation19_spill]] %s1361_s24  ;;  %s363_s23 = sshll.u32 %s355_s18, 4  ;;  %s1370_s23 = int_to_ptr.vmem [resolvable:$true] %s363_s23 }
  0x3f   : > { %s1381_s26 = scalar_lea.hbm %s1539_s1, %s878_s25  ;;  %s370_s27 = sand.u32 1, %s1197_s14  }
  0x40   : > { %s352_s24 = scalar_lea.sflag [#allocation4], %s351_s21  ;;  %s1047_s11 = scalar_lea.hbm %s1367_s6, 128 }
  0x41   : > { %p1048_p0 = scmp.ne.s32.totalorder %s1367_s6, %s1047_s11  ;;  %p1049_p3 = pneg %p1374_p13 }
  0x42   : > { %s1052_s30 = scalar_lea.hbm %s1538_s0, 256  ;;  %p1053_p9 = scmp.lt.u32.totalorder %s1367_s6, %s1538_s0 }
  0x43   : > { %p1050_p5 = pnand %p1049_p3, %p1048_p0  ;;  %p1054_p1 = scmp.lt.u32.totalorder %s1052_s30, %s1047_s11 }
  0x44   : > { %p1056_p4 = scmp.lt.u32.totalorder %s1047_s11, %s1367_s6 }
  0x45   : > { %p1051_p7 = pneg %p1050_p5  ;;  %p1055_p2 = por %p1054_p1, %p1053_p9 }
  0x47   : > { %p1057_p6 = por %p1056_p4, %p1055_p2 }
  0x49   : > { %p1058_p8 = pnand %p1057_p6, %p1051_p7 }
  0x4b   : > { %1061 = shalt.err (!%p1058_p8)
}
  0x4c   : > { %s1062_s21 = scalar_lea.vmem %s1370_s23, 128  ;;  %s1202_s25 = smov [#allocation3]  }
  0x4d   : > { %p1063_p11 = scmp.ne.s32.totalorder %s1370_s23, %s1062_s21  ;;  %s1067_s28 = sshll.u32 %s1202_s25, 4  ;;  %s1068_s28 = int_to_ptr.vmem [resolvable:$false] %s1067_s28 }
  0x4e   : > { %s1069_s9 = scalar_lea.vmem %s1068_s28, 256  ;;  %p1070_p5 = scmp.lt.s32.totalorder %s1370_s23, %s1068_s28 }
  0x4f   : > { %p1065_p12 = pnand %p1063_p11, %p1049_p3  ;;  %p1071_p9 = scmp.lt.s32.totalorder %s1069_s9, %s1062_s21 }
  0x51   : > { %p1066_p0 = pneg %p1065_p12  ;;  %p1072_p1 = por %p1071_p9, %p1070_p5 }
  0x53   : > { %p1073_p2 = pnand %p1072_p1, %p1066_p0 }
  0x55   : > { %1076 = shalt.err (!%p1073_p2)
}
  0x56   : > { %949 = dma.hbm_to_vmem [thread:$0]  (!%p1374_p13), %s1367_s6, 128, %s1370_s23, %s352_s24  }
  0x57   : > { %s374_s30 = scalar_lea.vmem [#allocation6], %s1358_s20  ;;  %s371_s18 = scalar_lea.sflag [#allocation7], %s370_s27 }
  0x58   : > { %s381_s11 = sshll.u32 %s374_s30, 4  ;;  %s1077_s29 = scalar_lea.hbm %s1381_s26, 128  ;;  %s382_s11 = int_to_ptr.vmem [resolvable:$true] %s381_s11 }
  0x59   : > { %p1078_p7 = scmp.ne.s32.totalorder %s1381_s26, %s1077_s29  ;;  %s1082_s25 = scalar_lea.hbm %s1539_s1, 256 }
  0x5a   : > { %p1083_p8 = scmp.lt.u32.totalorder %s1381_s26, %s1539_s1  ;;  %p1084_p11 = scmp.lt.u32.totalorder %s1082_s25, %s1077_s29 }
  0x5b   : > { %p1080_p4 = pnand %p1078_p7, %p1049_p3  ;;  %p1086_p0 = scmp.lt.u32.totalorder %s1077_s29, %s1381_s26 }
  0x5c   : > { %p1085_p12 = por %p1084_p11, %p1083_p8 }
  0x5d   : > { %p1081_p6 = pneg %p1080_p4 }
  0x5e   : > { %p1087_p5 = por %p1086_p0, %p1085_p12 }
  0x60   : > { %p1088_p9 = pnand %p1087_p5, %p1081_p6 }
  0x62   : > { %1091 = shalt.err (!%p1088_p9)
}
  0x63   : > { %s1092_s6 = scalar_lea.vmem %s382_s11, 128  ;;  %s1203_s23 = smov [#allocation6]  }
  0x64   : > { %p1093_p1 = scmp.ne.s32.totalorder %s382_s11, %s1092_s6  ;;  %s1097_s20 = sshll.u32 %s1203_s23, 4  ;;  %s1098_s20 = int_to_ptr.vmem [resolvable:$false] %s1097_s20 }
  0x65   : > { %s1099_s24 = scalar_lea.vmem %s1098_s20, 256  ;;  %p1100_p4 = scmp.lt.s32.totalorder %s382_s11, %s1098_s20 }
  0x66   : > { %p1095_p2 = pnand %p1093_p1, %p1049_p3  ;;  %p1101_p10 = scmp.lt.s32.totalorder %s1099_s24, %s1092_s6 }
  0x68   : > { %p1096_p7 = pneg %p1095_p2  ;;  %p1102_p8 = por %p1101_p10, %p1100_p4 }
  0x6a   : > { %p1103_p11 = pnand %p1102_p8, %p1096_p7 }
  0x6c   : > { %1106 = shalt.err (!%p1103_p11)
}
  0x6d   : > { %952 = dma.hbm_to_vmem [thread:$0]  (!%p1374_p13), %s1381_s26, 128, %s382_s11, %s371_s18  }
  0x6e   : > { %p1575_p6 = scmp.ne.s32.totalorder %s1566_s19, 0 }
  0x6f   : > { %s1434_s27 = sand.u32 (!%p1575_p6), 1, %s1181_s10   ;;  %p1576_p10 = scmp.ne.s32.totalorder (!%p1575_p6), %s1563_s17, 0 }
  0x70   : > { %390 = sbr.rel (%p1575_p6) target bundleno = 552 (0x228), region = 56  ;;  %s1437_s30 = sshll.u32 (!%p1575_p6), %s1434_s27, 3 }
  0x71   : > { %s393_s29 = scalar_lea.sflag (!%p1575_p6), [#allocation4], %s1434_s27  ;;  %s396_s13 = scalar_lea.vmem (!%p1575_p6), [#allocation3], %s1437_s30 }
  0x77   : > { %1160 = dma.done.wait (%p1576_p10), %s393_s29, 128  }
  0x78   : > { %1162 = vsyncadd (%p1576_p10), %s393_s29, 4294967168  ;;  %s401_s19 = sand.u32 1, %s1289_s15   ;;  %s405_s26 = scalar_lea.vmem [#allocation6], %s1437_s30 }
  0x79   : > { %s402_s16 = scalar_lea.sflag [#allocation7], %s401_s19 }
  0x7a   : > { %1164 = dma.done.wait (%p1576_p10), %s402_s16, 128  }
  0x7b   : > { %1166 = vsyncadd (%p1576_p10), %s402_s16, 4294967168  ;;  %p1577_p13 = scmp.eq.s32.totalorder %s1289_s15, 0 }
  0x7d   : > { %1168 = dma.done.wait (%p1577_p13), [#allocation7], 512   ;;  %p1578_p3 = pmov %p1577_p13 }
  0x7e   : > { %vm468_vm0 = vcmask 130048   ;;  %vm590_vm1 = vcmask 261120   ;;  %v467_v0 = vld [vmem:[%s405_s26] sm:$0xff]  ;;  %v589_v1 = vld [vmem:[%s396_s13] sm:$0xff]  ;;  %v1204_v13 = vmov 0.0|0.0   ;;  %vm1205_vm2 = vmmov 0  }
  0x7f   : > { %1170 = vsyncadd (%p1578_p3), [#allocation7], 4294966784  ;;  %v469_v2 = vsel %vm468_vm0, %v467_v0, 0.0  ;;  %v474_v3 = vmul.f32 %v467_v0, %v467_v0  ;;  %v591_v4 = vsel %vm590_vm1, %v589_v1, 0.0  ;;  %v596_v5 = vmul.f32 %v589_v1, %v589_v1  ;;  %v624_v8 = vld [vmem:[#allocation8] sm:$0xff]  ;;  %v625_v9 = vld [vmem:[#allocation8 + $0x8] sm:$0xff]  ;;  %926 = vmatprep.subr.bf16.mxu1 %v1204_v13  ;;  %923 = vmatprep.subr.bf16.mxu0 %v1204_v13 }
  0x80   : > { %470 = vadd.xlane.f32.xlu0 %v469_v2  ;;  %592 = vadd.xlane.f32.xlu1 %v591_v4  ;;  %v927_v10 = vpack.c.bf16 %v625_v9, %v624_v8  ;;  %v626_v11 = vld [vmem:[#allocation8 + $0x10] sm:$0xff]  ;;  %v627_v12 = vld [vmem:[#allocation8 + $0x18] sm:$0xff]  ;;  %v1206_v14 = vmov 0.0   ;;  %v512_v17 = vld [vmem:[%s1545_s7 + $0x8] sm:$0xff]  ;;  %vm587_vm3 = vcmask 253952   ;;  %s894_s19 = sshll.u32 %s1189_s12, 7 }
  0x81   : > { %v475_v6 = vsel %vm468_vm0, %v474_v3, 0.0  ;;  %v597_v7 = vsel %vm590_vm1, %v596_v5, 0.0  ;;  %920 = vmatprep.mubr.msk.f32.mxu1 %vm1205_vm2, %v1206_v14  ;;  %v930_v15 = vpack.c.bf16 %v627_v12, %v626_v11  ;;  %909 = vmatprep.mubr.msk.f32.mxu0 %vm1205_vm2, %v1206_v14  ;;  %v511_v16 = vld [vmem:[%s1545_s7] sm:$0xff]  ;;  %s455_s16 = scalar_lea.vmem [#allocation9], %s1437_s30  ;;  %s1579_s11 = sld [smem:[#allocation21_spill]] }
  0x82   : > { %928 = vmatpush3.bf16.msra.mxu1 %v927_v10  ;;  %v924_v18 = vpack.c.bf16 %v512_v17, %v511_v16  ;;  %v886_v38 = vld [vmem:[%s1542_s4] ss:$0 sm:$0xff]  ;;  %s725_s26 = sshll.u32 %s455_s16, 4  ;;  %s710_s25 = scalar_lea.sflag [#allocation5], %s1434_s27  ;;  %s1490_s26 = int_to_ptr.vmem [resolvable:$true] %s725_s26 }
  0x83   : > { %929 = vmatprep.subr.bf16.mxu1 %v1204_v13  ;;  %v889_v41 = vld [vmem:[%s1540_s2] ss:$0 sm:$0xff]  ;;  %s1107_s28 = scalar_lea.vmem %s1490_s26, 128  ;;  %p1581_p0 = scmp.ne.s32.totalorder %s1572_s22, 0 }
  0x84   : > { %476 = vadd.xlane.f32.xlu0 %v475_v6  ;;  %598 = vadd.xlane.f32.xlu1 %v597_v7  ;;  %v887_v43 = vld [vmem:[%s1543_s5] ss:$0 sm:$0xff]  ;;  %p1108_p12 = scmp.ne.s32.totalorder %s1490_s26, %s1107_s28  ;;  %s1207_s12 = smov [#allocation9]  }
  0x85   : > { %925 = vmatpush3.bf16.msra.mxu0 %v924_v18  ;;  %v890_v45 = vld [vmem:[%s1541_s3] ss:$0 sm:$0xff]  ;;  %s1111_s30 = sshll.u32 %s1207_s12, 4  ;;  %s1112_s30 = int_to_ptr.vmem [resolvable:$false] %s1111_s30 }
  0x86   : > { %931 = vmatpush3.bf16.msra.mxu1 %v930_v15  ;;  %v513_v59 = vld [vmem:[%s1546_s8] sm:$0x1]  ;;  %p1109_p5 = pnand %p1108_p12, %p1581_p0  ;;  %s1113_s9 = scalar_lea.vmem %s1112_s30, 256 }
  0x87   : > { %s1580_s18 = smov %s1579_s11  ;;  %s1488_s21 = scalar_lea.hbm %s1579_s11, %s894_s19 }
  0x88   : > { %p1110_p9 = pneg %p1109_p5  ;;  %p1114_p1 = scmp.lt.s32.totalorder %s1490_s26, %s1112_s30 }
  0x89   : > { %p1115_p2 = scmp.lt.s32.totalorder %s1113_s9, %s1107_s28 }
  0x8b   : > { %p1116_p7 = por %p1115_p2, %p1114_p1 }
  0x8d   : > { %p1117_p4 = pnand %p1116_p7, %p1110_p9 }
 0x10d   : > { %v471_v19 = vpop.xlane.xlu0 %470  ;;  %v593_v20 = vpop.xlane.xlu1 %592 }
 0x10e   : > { %v473_v21 = vmul.f32 0.0625, %v471_v19  ;;  %v595_v22 = vmul.f32 0.03125, %v593_v20 }
 0x110   : > { %v601_v23 = vmul.f32 %v595_v22, %v595_v22  ;;  %v479_v26 = vmul.f32 %v473_v21, %v473_v21  ;;  %v604_v35 = vsub.f32 %v589_v1, %v595_v22  ;;  %v482_v36 = vsub.f32 %v467_v0, %v473_v21 }
 0x111   : > { %v477_v24 = vpop.xlane.xlu0 %476  ;;  %v599_v25 = vpop.xlane.xlu1 %598 }
 0x112   : > { %v478_v27 = vmul.f32 0.0625, %v477_v24  ;;  %v600_v28 = vmul.f32 0.03125, %v599_v25 }
 0x114   : > { %v480_v29 = vsub.f32 %v478_v27, %v479_v26  ;;  %v602_v30 = vsub.f32 %v600_v28, %v601_v23 }
 0x116   : > { %v481_v31 = vmax.f32 %v480_v29, 0.0  ;;  %v603_v32 = vmax.f32 %v602_v30, 0.0 }
 0x118   : > { %v483_v33 = vadd.f32 1e-05, %v481_v31  ;;  %v605_v34 = vadd.f32 1e-05, %v603_v32 }
 0x11a   : > { %1015 = vrsqrt.f32 %v483_v33 }
 0x11b   : > { %1017 = vrsqrt.f32 %v605_v34 }
 0x124   : > { %v1016_v37 = vpop.eup %1015 }
 0x125   : > { %v1018_v39 = vpop.eup %1017  ;;  %v485_v40 = vmul.f32 %v1016_v37, %v482_v36 }
 0x126   : > { %v607_v42 = vmul.f32 %v1018_v39, %v604_v35 }
 0x127   : > { %v493_v44 = vmul.f32 %v886_v38, %v485_v40 }
 0x128   : > { %v615_v46 = vmul.f32 %v889_v41, %v607_v42 }
 0x129   : > { %v501_v47 = vadd.f32 %v887_v43, %v493_v44 }
 0x12a   : > { %v623_v48 = vadd.f32 %v890_v45, %v615_v46 }
 0x12b   : > { %v502_v49 = vsel %vm468_vm0, %v501_v47, 0.0 }
 0x12c   : > { %921 = vmatmul.mubr.msk.f32.vlgmr.msra.gmra.mrb[0].mxu1 %vm590_vm1, %v623_v48  ;;  %v503_v50 = vrot.slane %v502_v49, 4 }
 0x12e   : > { %v504_v51 = vadd.f32 %v503_v50, %v502_v49 }
 0x130   : > { %v505_v52 = vrot.slane %v504_v51, 2 }
 0x132   : > { %v506_v53 = vadd.f32 %v505_v52, %v504_v51 }
 0x134   : > { %v507_v54 = vrot.slane %v506_v53, 1 }
 0x136   : > { %v508_v55 = vadd.f32 %v507_v54, %v506_v53 }
 0x138   : > { %v510_v56 = vmul.f32 0.125, %v508_v55 }
 0x13a   : > { %910 = vmatmul.mubr.msk.f32.vlgmr.msra.gmra.mrb[0].mxu0 %vm468_vm0, %v510_v56 }
 0x1ff   : > { %v704_v57 = vpop.f32.mrb[0].mxu1 }
 0x200   : > { %v922_v58 = vpop.f32.mrb[1].mxu1 }
 0x20d   : > { %v583_v60 = vpop.f32.mrb[0].mxu0 }
 0x20e   : > { %v584_v61 = vadd.f32 %v583_v60, %v513_v59  ;;  %v911_v62 = vpop.f32.mrb[1].mxu0 }
 0x210   : > { %588 = vst.msk [vmem:[#allocation2] sm:$0x1] %vm587_vm3, %v584_v61 }
 0x217   : > { %v891_v63 = vld [vmem:[#allocation2] ss:$0 sm:$0xff] }
 0x218   : > { %v705_v0 = vadd.f32 %v891_v63, %v704_v57 }
 0x21a   : > { %708 = vst.msk [vmem:[%s455_s16] sm:$0xff] %vm590_vm1, %v705_v0 }
 0x21b   : > { %1120 = shalt.err (!%p1117_p4)
}
 0x21c   : > { %s1121_s27 = scalar_lea.hbm %s1488_s21, 128  ;;  %s1125_s20 = scalar_lea.hbm %s1580_s18, 256 }
 0x21d   : > { %p1122_p8 = scmp.ne.s32.totalorder %s1488_s21, %s1121_s27  ;;  %p1126_p10 = scmp.lt.u32.totalorder %s1488_s21, %s1580_s18 }
 0x21e   : > { %p1127_p13 = scmp.lt.u32.totalorder %s1125_s20, %s1121_s27  ;;  %p1129_p12 = scmp.lt.u32.totalorder %s1121_s27, %s1488_s21 }
 0x21f   : > { %p1123_p11 = pnand %p1122_p8, %p1581_p0 }
 0x220   : > { %p1128_p3 = por %p1127_p13, %p1126_p10 }
 0x221   : > { %p1124_p6 = pneg %p1123_p11 }
 0x222   : > { %p1130_p5 = por %p1129_p12, %p1128_p3 }
 0x224   : > { %p1131_p9 = pnand %p1130_p5, %p1124_p6 }
 0x226   : > { %1134 = shalt.err (!%p1131_p9)
}
 0x227   : > { %940 = dma.vmem_to_hbm [thread:$0]  (%p1581_p0), %s1490_s26, 128, %s1488_s21, %s710_s25  }
 0x228 PF: > { %s1582_s13 = sld [smem:[#allocation14_spill]]  ;;  %s1583_s19 = sld [smem:[#allocation17_spill]] }
 0x229   : > { %p1585_p2 = scmp.ge.s32.totalorder %s1197_s14, 2 }
 0x22e   : > { %s737_s16 = sand.u32 1, %s1582_s13   ;;  %p1584_p1 = scmp.ne.s32.totalorder %s1583_s19, 0 }
 0x22f   : > { %s738_s15 = scalar_lea.sflag [#allocation5], %s737_s16 }
 0x230   : > { %p954_p7 = pnand %p1585_p2, %p1584_p1 }
 0x232   : > { %1172 = dma.done.wait (!%p954_p7), %s738_s15, 128  }
 0x233   : > { %1174 = vsyncadd (!%p954_p7), %s738_s15, 4294967168  ;;  %s28_s14 = sadd.s32 1, %s1197_s14   ;;  %s1586_s17 = sld [smem:[#allocation15_spill]] }
 0x234   : > { %p25_p4 = scmp.ge.s32.totalorder %s28_s14, 4   ;;  %s1587_s11 = sld [smem:[#allocation19_spill]] }
 0x235   : > { %s1588_s12 = sld [smem:[#allocation16_spill]]  ;;  %s1589_s13 = sld [smem:[#allocation18_spill]] }
 0x236   : > { %s1590_s30 = smov %s1181_s10  ;;  %27 = sbr.rel (!%p25_p4) target bundleno = 11 (0xb), region = 129 }
 0x239   : > { %s1591_s10 = smov %s1586_s17 }
 0x23d   :  { %743 = vsyncpa [#allocation4], 1 }
 0x23e   :  { %745 = vsyncpa [#allocation4 + $0x1], 1 }
 0x23f   :  { %746 = vsyncpa [#allocation7], 1 }
 0x240   :  { %748 = vsyncpa [#allocation7 + $0x1], 1 }
 0x241   :  { %749 = vsyncpa [#allocation5], 1 }
 0x242   :  { %751 = vsyncpa [#allocation5 + $0x1], 1 }

</bundles_post_ra>
